<compile_context>
chip_gen: v7x
topology: tpu7x:2x2x1
jax: 0.10.0
libtpu: 0.0.40
codegen_flags: <defaults>
</compile_context>

<pallas_src>
import jax
import jax.numpy as jnp
from jax import lax
from jax.experimental import pallas as pl
from jax.experimental.pallas import tpu as pltpu

IN_SHAPE = 64 * 64 * 3   # 12288
OUT_SHAPE = 6


def linear_kernel(x_ref, w_ref, b_ref, o_ref):
    # x_ref: (tb, K), w_ref: (OUT, K) lane-dense, b_ref: (1, OUT)
    logits = lax.dot_general(
        x_ref[...], w_ref[...],
        dimension_numbers=(((1,), (1,)), ((), ())),   # contract K with K
        preferred_element_type=jnp.float32,
    )
    o_ref[...] = (logits + b_ref[...]).astype(o_ref.dtype)


def linear_classifier_forward(x, weight, bias, *, tb=256):
    """x: (B, 3, 64, 64), weight: (6, 12288), bias: (6,) -> (B, 6)."""
    B = x.shape[0]
    K = IN_SHAPE
    x_flat = x.reshape(B, K)                  # same element order as torch .view
    b2 = bias.reshape(1, OUT_SHAPE)           # (1, 6)

    # Batch tiling: single block if it fits, else 256-row tiles (pad if needed).
    if B <= tb:
        tb_eff = B
        Bp = B
        x_in = x_flat
    else:
        tb_eff = tb
        Bp = pl.cdiv(B, tb_eff) * tb_eff
        x_in = x_flat if Bp == B else jnp.pad(x_flat, ((0, Bp - B), (0, 0)))

    n_b = Bp // tb_eff

    out = pl.pallas_call(
        linear_kernel,
        out_shape=jax.ShapeDtypeStruct((Bp, OUT_SHAPE), x.dtype),
        grid_spec=pltpu.PrefetchScalarGridSpec(
            num_scalar_prefetch=0,
            grid=(n_b,),
            in_specs=[
                pl.BlockSpec((tb_eff, K), lambda i: (i, 0)),          # x tile, full K
                pl.BlockSpec((OUT_SHAPE, K), lambda i: (0, 0)),       # W, lane-dense, resident
                pl.BlockSpec((1, OUT_SHAPE), lambda i: (0, 0)),       # bias, resident
            ],
            out_specs=pl.BlockSpec((tb_eff, OUT_SHAPE), lambda i: (i, 0)),
        ),
        compiler_params=pltpu.CompilerParams(
            dimension_semantics=("parallel",),   # batch axis -> megacore shardable
        ),
    )(x_in, weight, b2)

    return out[:B] if Bp != B else out


if __name__ == "__main__":
    key = jax.random.PRNGKey(0)
    kx, kw, kb = jax.random.split(key, 3)

    B = 2
    x = jax.random.normal(kx, (B, 3, 64, 64), dtype=jnp.float32)

    # Deterministic parameter init mimicking torch.nn.Linear defaults:
    # uniform(-1/sqrt(in_features), 1/sqrt(in_features))
    bound = 1.0 / (IN_SHAPE ** 0.5)
    weight = jax.random.uniform(
        kw, (OUT_SHAPE, IN_SHAPE), minval=-bound, maxval=bound, dtype=jnp.float32
    )
    bias = jax.random.uniform(
        kb, (OUT_SHAPE,), minval=-bound, maxval=bound, dtype=jnp.float32
    )

    out = linear_classifier_forward(x, weight, bias)
    out = jax.block_until_ready(out)

    # Reference check in plain JAX
    ref = x.reshape(B, IN_SHAPE) @ weight.T + bias
    assert out.shape == (B, OUT_SHAPE)
    assert jnp.allclose(out, ref, atol=1e-4, rtol=1e-4)

    print("KERNEL_OK")
</pallas_src>

<mosaic_0001>
module attributes {stable_mosaic.version = 11 : i64} {
  func.func @linear_kernel(%arg0: i32, %arg1: memref<2x12288xf32, #tpu.memory_space<vmem>>, %arg2: memref<6x12288xf32, #tpu.memory_space<vmem>>, %arg3: memref<1x6xf32, #tpu.memory_space<vmem>>, %arg4: memref<2x6xf32, #tpu.memory_space<vmem>>) attributes {dimension_semantics = [#tpu.dimension_semantics<parallel>], iteration_bounds = array<i64: 1>, scalar_prefetch = 0 : i64, scratch_operands = 0 : i64, tpu.core_type = #tpu.core_type<tc>, window_params = [{transform_indices = @transform_0, window_bounds = array<i64: 2, 12288>}, {pipeline_mode = #tpu.pipeline_mode<synchronous>, transform_indices = @transform_1, window_bounds = array<i64: 6, 12288>}, {pipeline_mode = #tpu.pipeline_mode<synchronous>, transform_indices = @transform_2, window_bounds = array<i64: 1, 6>}, {transform_indices = @transform_3, window_bounds = array<i64: 2, 6>}]} {
    %c0 = arith.constant 0 : index
    %c0_0 = arith.constant 0 : index
    %0 = vector.load %arg1[%c0, %c0_0] : memref<2x12288xf32, #tpu.memory_space<vmem>>, vector<2x12288xf32>
    %c0_1 = arith.constant 0 : index
    %c0_2 = arith.constant 0 : index
    %1 = vector.load %arg2[%c0_1, %c0_2] : memref<6x12288xf32, #tpu.memory_space<vmem>>, vector<6x12288xf32>
    %cst = arith.constant dense<0.000000e+00> : vector<2x6xf32>
    %2 = tpu.matmul %0, %1, %cst {dimension_numbers = #tpu.dot_dimension_numbers<[1], [1], [0], [0], [0, 0, 1, 0], [], []>} : vector<2x12288xf32>, vector<6x12288xf32>, vector<2x6xf32> -> vector<2x6xf32>
    %c0_3 = arith.constant 0 : index
    %c0_4 = arith.constant 0 : index
    %3 = vector.load %arg3[%c0_3, %c0_4] : memref<1x6xf32, #tpu.memory_space<vmem>>, vector<1x6xf32>
    %4 = vector.broadcast %3 : vector<1x6xf32> to vector<2x6xf32>
    %5 = arith.addf %2, %4 : vector<2x6xf32>
    %c0_5 = arith.constant 0 : index
    %c0_6 = arith.constant 0 : index
    %6 = vector.load %arg4[%c0_5, %c0_6] : memref<2x6xf32, #tpu.memory_space<vmem>>, vector<2x6xf32>
    tpu.vector_store %arg4[%c0_5, %c0_6], %5 {strides = array<i32>} : memref<2x6xf32, #tpu.memory_space<vmem>>, vector<2x6xf32>,
    return
  }
  func.func @transform_0(%arg0: i32) -> (i32, i32) {
    %c0_i32 = arith.constant 0 : i32
    %c0_i32_0 = arith.constant 0 : i32
    return %arg0, %c0_i32 : i32, i32
  }
  func.func @transform_1(%arg0: i32) -> (i32, i32) {
    %c0_i32 = arith.constant 0 : i32
    %c0_i32_0 = arith.constant 0 : i32
    %c0_i32_1 = arith.constant 0 : i32
    return %c0_i32, %c0_i32_0 : i32, i32
  }
  func.func @transform_2(%arg0: i32) -> (i32, i32) {
    %c0_i32 = arith.constant 0 : i32
    %c0_i32_0 = arith.constant 0 : i32
    %c0_i32_1 = arith.constant 0 : i32
    return %c0_i32, %c0_i32_0 : i32, i32
  }
  func.func @transform_3(%arg0: i32) -> (i32, i32) {
    %c0_i32 = arith.constant 0 : i32
    %c0_i32_0 = arith.constant 0 : i32
    return %arg0, %c0_i32 : i32, i32
  }
}

</mosaic_0001>

<bundles_post_ra>
// kernel: tpu_custom_call.1
= control target key start
LH: loop header
LB: loop body
LE: loop exit
PB: predicated region body
PF: predicated region fallthrough
CT: control target
= control target key end

     0   :  { %8 = vsyncpa [#allocation3], 0  ;;  %s4380_s0 = inlined_call_operand.hbm [shape: f32[2,12288], index: 0, kind: input, shape index: {}]   ;;  %s4381_s1 = inlined_call_operand.hbm [shape: f32[6,12288], index: 1, kind: input, shape index: {}]   ;;  %s4382_s2 = inlined_call_operand.vmem [shape: f32[1,6], index: 2, kind: input, shape index: {}]   ;;  %s4383_s3 = inlined_call_operand.hbm [shape: f32[2,6], index: 3, kind: output, shape index: {}]  }
   0x1   :  { %9 = vsyncpa [#allocation6], 0 }
   0x2   :  { %10 = vsyncpa [#allocation4], 0  ;;  %s4267_s12 = smov [#allocation2]   ;;  %s4268_s14 = smov [#allocation5]  }
   0x3   :  { %s17_s13 = sshll.u32 %s4267_s12, 4  ;;  %s27_s15 = sshll.u32 %s4268_s14, 4  ;;  %s18_s13 = int_to_ptr.vmem [resolvable:$true] %s17_s13  ;;  %s28_s15 = int_to_ptr.vmem [resolvable:$true] %s27_s15 }
   0x4   :  { %s4195_s18 = scalar_lea.hbm %s4380_s0, 3072 }
   0x5   :  { %p4196_p0 = scmp.ne.s32.totalorder %s4380_s0, %s4195_s18  ;;  %p4199_p1 = scmp.lt.u32.totalorder %s4195_s18, %s4380_s0 }
   0x7   :  { %p4201_p2 = pnand %p4199_p1, %p4196_p0 }
   0x9   :  { %4204 = shalt.err (!%p4201_p2)
}
   0xa   :  { %s4205_s23 = scalar_lea.vmem %s18_s13, 3072  ;;  %p4210_p4 = scmp.lt.s32.totalorder %s18_s13, %s18_s13 }
   0xb   :  { %p4206_p3 = scmp.ne.s32.totalorder %s18_s13, %s4205_s23  ;;  %p4211_p5 = scmp.lt.s32.totalorder %s4205_s23, %s4205_s23 }
   0xd   :  { %p4212_p6 = por %p4211_p5, %p4210_p4 }
   0xf   :  { %p4213_p7 = pnand %p4212_p6, %p4206_p3 }
  0x11   :  { %4216 = shalt.err (!%p4213_p7)
}
  0x12   :  { %20 = dma.hbm_to_vmem [thread:$0]  %s4380_s0, 3072, %s18_s13, [#allocation3]  }
  0x13   :  { %s4217_s28 = scalar_lea.hbm %s4381_s1, 12288 }
  0x14   :  { %p4218_p8 = scmp.ne.s32.totalorder %s4381_s1, %s4217_s28  ;;  %p4221_p9 = scmp.lt.u32.totalorder %s4217_s28, %s4381_s1 }
  0x16   :  { %p4223_p10 = pnand %p4221_p9, %p4218_p8 }
  0x18   :  { %4226 = shalt.err (!%p4223_p10)
}
  0x19   :  { %s4227_s6 = scalar_lea.vmem %s28_s15, 12288  ;;  %p4232_p12 = scmp.lt.s32.totalorder %s28_s15, %s28_s15 }
  0x1a   :  { %p4228_p11 = scmp.ne.s32.totalorder %s28_s15, %s4227_s6  ;;  %p4233_p13 = scmp.lt.s32.totalorder %s4227_s6, %s4227_s6 }
  0x1c   :  { %p4234_p0 = por %p4233_p13, %p4232_p12 }
  0x1e   :  { %p4235_p1 = pnand %p4234_p0, %p4228_p11 }
  0x20   :  { %4238 = shalt.err (!%p4235_p1)
}
  0x21   :  { %30 = dma.hbm_to_vmem [thread:$0]  %s4381_s1, 12288, %s28_s15, [#allocation6]  }
  0x22   :  { %4261 = dma.done.wait [#allocation3], 3072  }
  0x23   :  { %4262 = vsyncadd [#allocation3], 4294964224 }
  0x24   :  { %4263 = dma.done.wait [#allocation6], 12288  }
  0x25   :  { %4264 = vsyncadd [#allocation6], 4294955008  ;;  %v194_v0 = vlaneseq  ;;  %v4269_v1 = vmov 1983009808   ;;  %v64_v6 = vld [vmem:[#allocation5 + $0x8] sm:$0x3f] }
  0x26   :  { %v192_v2 = vunpack.c.l.s4 %v4269_v1  ;;  %v63_v7 = vld [vmem:[#allocation5] sm:$0x3f]  ;;  %v112_v8 = vld [vmem:[#allocation5 + $0x188] sm:$0x3f]  ;;  %694 = vmatprep.subr.mxu1 %v64_v6  ;;  %v66_v11 = vld [vmem:[#allocation5 + $0x18] sm:$0x3f] }
  0x27   :  { %v195_v3 = vshrl.u32 %v194_v0, 7  ;;  %2374 = vmatprep.subr.mxu0 %v112_v8  ;;  %v111_v9 = vld [vmem:[#allocation5 + $0x180] sm:$0x3f]  ;;  %695 = vmatpush1.xpose.msra.mxu1 %v63_v7  ;;  %v114_v15 = vld [vmem:[#allocation5 + $0x198] sm:$0x3f]  ;;  %v40_v25 = vld [vmem:[#allocation2 + $0x8] sm:$0xff] }
  0x28   :  { %v193_v4 = vunpack.c.0.s8 %v192_v2  ;;  %v39_v10 = vld [vmem:[#allocation2] sm:$0xff]  ;;  %2375 = vmatpush1.xpose.msra.mxu0 %v111_v9  ;;  %764 = vmatprep.subr.mxu1 %v66_v11  ;;  %v65_v21 = vld [vmem:[#allocation5 + $0x10] sm:$0x3f]  ;;  %v68_v26 = vld [vmem:[#allocation5 + $0x28] sm:$0x3f]  ;;  %v207_v34 = vcombine.high %v40_v25, %v40_v25  ;;  %s4270_s9 = smov [#allocation7]  }
  0x29   :  { %v190_v12 = vcombine.high %v39_v10, %v39_v10  ;;  %v51_v14 = vld [vmem:[#allocation2 + $0x60] sm:$0xff]  ;;  %2444 = vmatprep.subr.mxu0 %v114_v15  ;;  %v113_v23 = vld [vmem:[#allocation5 + $0x190] sm:$0x3f]  ;;  %v52_v28 = vld [vmem:[#allocation2 + $0x68] sm:$0xff]  ;;  %s4062_s10 = sshll.u32 %s4270_s9, 4  ;;  %vm4054_vm0 = vcmask 41984   ;;  %s4063_s10 = int_to_ptr.vmem [resolvable:$true] %s4062_s10 }
  0x2a   :  { %v4315_v5 = vsub.s32 %v193_v4, %v195_v3  ;;  %v394_v16 = vcombine.high %v51_v14, %v51_v14  ;;  %v116_v29 = vld [vmem:[#allocation5 + $0x1a8] sm:$0x3f]  ;;  %v67_v32 = vld [vmem:[#allocation5 + $0x20] sm:$0x3f]  ;;  %v411_v37 = vcombine.high %v52_v28, %v52_v28  ;;  %v70_v38 = vld [vmem:[#allocation5 + $0x38] sm:$0x3f]  ;;  %p4244_p3 = scmp.lt.s32.totalorder %s4063_s10, %s4063_s10 }
  0x2b   :  { %v115_v35 = vld [vmem:[#allocation5 + $0x1a0] sm:$0x3f]  ;;  %v118_v39 = vld [vmem:[#allocation5 + $0x1b8] sm:$0x3f]  ;;  %v69_v42 = vld [vmem:[#allocation5 + $0x30] sm:$0x3f] }
  0x2c   :  { %v197_v13 = vrot.slane %v39_v10, %v4315_v5  ;;  %v401_v17 = vrot.slane %v51_v14, %v4315_v5  ;;  %v204_v19 = vrot.slane %v190_v12, %v4315_v5  ;;  %v408_v22 = vrot.slane %v394_v16, %v4315_v5  ;;  %v117_v44 = vld [vmem:[#allocation5 + $0x1b0] sm:$0x3f]  ;;  %v72_v47 = vld [vmem:[#allocation5 + $0x48] sm:$0x3f]  ;;  %v71_v52 = vld [vmem:[#allocation5 + $0x40] sm:$0x3f] }
  0x2d   :  { %v214_v30 = vrot.slane %v40_v25, %v4315_v5  ;;  %v418_v31 = vrot.slane %v52_v28, %v4315_v5  ;;  %v221_v40 = vrot.slane %v207_v34, %v4315_v5  ;;  %v425_v41 = vrot.slane %v411_v37, %v4315_v5  ;;  %v41_v46 = vld [vmem:[#allocation2 + $0x10] sm:$0xff]  ;;  %v120_v49 = vld [vmem:[#allocation5 + $0x1c8] sm:$0x3f]  ;;  %v119_v55 = vld [vmem:[#allocation5 + $0x1c0] sm:$0x3f]  ;;  %s4239_s11 = scalar_lea.vmem %s4063_s10, 32 }
  0x2e   :  { %v205_v18 = vcombine.high %v197_v13, %v197_v13  ;;  %v409_v20 = vcombine.high %v401_v17, %v401_v17  ;;  %v206_v24 = vcombine.high %v204_v19, %v204_v19  ;;  %v410_v27 = vcombine.high %v408_v22, %v408_v22  ;;  %v53_v48 = vld [vmem:[#allocation2 + $0x70] sm:$0xff]  ;;  %v74_v58 = vld [vmem:[#allocation5 + $0x58] sm:$0x3f]  ;;  %v76_v3 = vld [vmem:[#allocation5 + $0x68] sm:$0x3f]  ;;  %p4240_p2 = scmp.ne.s32.totalorder %s4063_s10, %s4239_s11  ;;  %p4245_p4 = scmp.lt.s32.totalorder %s4239_s11, %s4239_s11 }
  0x2f   :  { %v222_v33 = vcombine.high %v214_v30, %v214_v30  ;;  %v426_v36 = vcombine.high %v418_v31, %v418_v31  ;;  %v223_v43 = vcombine.high %v221_v40, %v221_v40  ;;  %v427_v45 = vcombine.high %v425_v41, %v425_v41  ;;  %v122_v59 = vld [vmem:[#allocation5 + $0x1d8] sm:$0x3f]  ;;  %v73_v62 = vld [vmem:[#allocation5 + $0x50] sm:$0x3f]  ;;  %v124_v6 = vld [vmem:[#allocation5 + $0x1e8] sm:$0x3f] }
  0x30   :  { %758 = vmatprep.mubr.f32.mxu1 %v205_v18  ;;  %2438 = vmatprep.mubr.f32.mxu0 %v409_v20  ;;  %v231_v50 = vrot.slane %v41_v46, %v4315_v5  ;;  %v435_v51 = vrot.slane %v53_v48, %v4315_v5  ;;  %v224_v54 = vcombine.high %v41_v46, %v41_v46  ;;  %v121_v0 = vld [vmem:[#allocation5 + $0x1d0] sm:$0x3f]  ;;  %v42_v2 = vld [vmem:[#allocation2 + $0x18] sm:$0xff]  ;;  %v75_v9 = vld [vmem:[#allocation5 + $0x60] sm:$0x3f]  ;;  %p4246_p5 = por %p4245_p4, %p4244_p3 }
  0x31   :  { %759 = vmatmul.mubr.f32.vlgmr.msra.gmra.mrb[0].mxu1 %v197_v13  ;;  %2439 = vmatmul.mubr.f32.vlgmr.msra.gmra.mrb[0].mxu0 %v401_v17  ;;  %v428_v57 = vcombine.high %v53_v48, %v53_v48  ;;  %v54_v4 = vld [vmem:[#allocation2 + $0x78] sm:$0xff]  ;;  %v248_v7 = vrot.slane %v42_v2, %v4315_v5  ;;  %v241_v11 = vcombine.high %v42_v2, %v42_v2  ;;  %v123_v12 = vld [vmem:[#allocation5 + $0x1e0] sm:$0x3f]  ;;  %v132_v46 = vld [vmem:[#allocation5 + $0x228] sm:$0x3f] }
  0x32   :  { %765 = vmatpush1.xpose.msra.mxu1 %v65_v21  ;;  %2445 = vmatpush1.xpose.msra.mxu0 %v113_v23  ;;  %v239_v53 = vcombine.high %v231_v50, %v231_v50  ;;  %v443_v56 = vcombine.high %v435_v51, %v435_v51  ;;  %v238_v60 = vrot.slane %v224_v54, %v4315_v5  ;;  %v78_v15 = vld [vmem:[#allocation5 + $0x78] sm:$0x3f]  ;;  %v125_v21 = vld [vmem:[#allocation5 + $0x1f0] sm:$0x3f]  ;;  %v43_v23 = vld [vmem:[#allocation2 + $0x20] sm:$0xff]  ;;  %p4247_p6 = pnand %p4246_p5, %p4240_p2 }
  0x33   :  { %828 = vmatprep.mubr.f32.mxu1 %v206_v24  ;;  %834 = vmatprep.subr.mxu1 %v68_v26  ;;  %v442_v61 = vrot.slane %v428_v57, %v4315_v5  ;;  %v452_v8 = vrot.slane %v54_v4, %v4315_v5  ;;  %v256_v10 = vcombine.high %v248_v7, %v248_v7  ;;  %v126_v16 = vld [vmem:[#allocation5 + $0x1f8] sm:$0x3f]  ;;  %v80_v24 = vld [vmem:[#allocation5 + $0x88] sm:$0x3f]  ;;  %v55_v25 = vld [vmem:[#allocation2 + $0x80] sm:$0xff] }
  0x34   :  { %2508 = vmatprep.mubr.f32.mxu0 %v410_v27  ;;  %2514 = vmatprep.subr.mxu0 %v116_v29  ;;  %v240_v63 = vcombine.high %v238_v60, %v238_v60  ;;  %v445_v14 = vcombine.high %v54_v4, %v54_v4  ;;  %v255_v17 = vrot.slane %v241_v11, %v4315_v5  ;;  %v128_v26 = vld [vmem:[#allocation5 + $0x208] sm:$0x3f]  ;;  %v79_v29 = vld [vmem:[#allocation5 + $0x80] sm:$0x3f] }
  0x35   :  { %v444_v1 = vcombine.high %v442_v61, %v442_v61  ;;  %v460_v13 = vcombine.high %v452_v8, %v452_v8  ;;  %v265_v27 = vrot.slane %v43_v23, %v4315_v5  ;;  %v469_v28 = vrot.slane %v55_v25, %v4315_v5  ;;  %v136_v2 = vld [vmem:[#allocation5 + $0x248] sm:$0x3f] }
  0x36   :  { %v459_v18 = vrot.slane %v445_v14, %v4315_v5  ;;  %v257_v20 = vcombine.high %v255_v17, %v255_v17  ;;  %v462_v34 = vcombine.high %v55_v25, %v55_v25 }
  0x39   :  { %829 = vmatmul.mubr.f32.vlgmr.msra.gmra.mrb[0].mxu1 %v204_v19  ;;  %2509 = vmatmul.mubr.f32.vlgmr.msra.gmra.mrb[0].mxu0 %v408_v22  ;;  %v77_v19 = vld [vmem:[#allocation5 + $0x70] sm:$0x3f]  ;;  %v461_v22 = vcombine.high %v459_v18, %v459_v18 }
  0x3a   :  { %835 = vmatpush1.xpose.msra.mxu1 %v67_v32  ;;  %2515 = vmatpush1.xpose.msra.mxu0 %v115_v35  ;;  %v127_v32 = vld [vmem:[#allocation5 + $0x200] sm:$0x3f]  ;;  %v82_v35 = vld [vmem:[#allocation5 + $0x98] sm:$0x3f] }
  0x3b   :  { %898 = vmatprep.mubr.f32.mxu1 %v222_v33  ;;  %904 = vmatprep.subr.mxu1 %v70_v38  ;;  %v477_v33 = vcombine.high %v469_v28, %v469_v28  ;;  %v476_v38 = vrot.slane %v462_v34, %v4315_v5 }
  0x3c   :  { %2578 = vmatprep.mubr.f32.mxu0 %v426_v36  ;;  %2584 = vmatprep.subr.mxu0 %v118_v39  ;;  %v130_v36 = vld [vmem:[#allocation5 + $0x218] sm:$0x3f]  ;;  %v81_v39 = vld [vmem:[#allocation5 + $0x90] sm:$0x3f] }
  0x41   :  { %899 = vmatmul.mubr.f32.vlgmr.msra.gmra.mrb[0].mxu1 %v214_v30  ;;  %2579 = vmatmul.mubr.f32.vlgmr.msra.gmra.mrb[0].mxu0 %v418_v31  ;;  %v273_v30 = vcombine.high %v265_v27, %v265_v27  ;;  %v258_v31 = vcombine.high %v43_v23, %v43_v23  ;;  %v140_v23 = vld [vmem:[#allocation5 + $0x268] sm:$0x3f] }
  0x42   :  { %905 = vmatpush1.xpose.msra.mxu1 %v69_v42  ;;  %2585 = vmatpush1.xpose.msra.mxu0 %v117_v44  ;;  %v478_v42 = vcombine.high %v476_v38, %v476_v38  ;;  %v84_v44 = vld [vmem:[#allocation5 + $0xa8] sm:$0x3f] }
  0x43   :  { %968 = vmatprep.mubr.f32.mxu1 %v223_v43  ;;  %974 = vmatprep.subr.mxu1 %v72_v47  ;;  %v272_v37 = vrot.slane %v258_v31, %v4315_v5  ;;  %v44_v43 = vld [vmem:[#allocation2 + $0x28] sm:$0xff] }
  0x44   :  { %2648 = vmatprep.mubr.f32.mxu0 %v427_v45  ;;  %2654 = vmatprep.subr.mxu0 %v120_v49  ;;  %v56_v45 = vld [vmem:[#allocation2 + $0x88] sm:$0xff]  ;;  %v282_v47 = vrot.slane %v44_v43, %v4315_v5  ;;  %v83_v49 = vld [vmem:[#allocation5 + $0xa0] sm:$0x3f] }
  0x45   :  { %v486_v48 = vrot.slane %v56_v45, %v4315_v5  ;;  %v479_v54 = vcombine.high %v56_v45, %v56_v45 }
  0x49   :  { %969 = vmatmul.mubr.f32.vlgmr.msra.gmra.mrb[0].mxu1 %v221_v40  ;;  %2649 = vmatmul.mubr.f32.vlgmr.msra.gmra.mrb[0].mxu0 %v425_v41  ;;  %v274_v40 = vcombine.high %v272_v37, %v272_v37  ;;  %v129_v41 = vld [vmem:[#allocation5 + $0x210] sm:$0x3f] }
  0x4a   :  { %975 = vmatpush1.xpose.msra.mxu1 %v71_v52  ;;  %2655 = vmatpush1.xpose.msra.mxu0 %v119_v55  ;;  %v131_v52 = vld [vmem:[#allocation5 + $0x220] sm:$0x3f]  ;;  %v86_v55 = vld [vmem:[#allocation5 + $0xb8] sm:$0x3f] }
  0x4b   :  { %1038 = vmatprep.mubr.f32.mxu1 %v239_v53  ;;  %1044 = vmatprep.subr.mxu1 %v74_v58  ;;  %v494_v53 = vcombine.high %v486_v48, %v486_v48  ;;  %v493_v58 = vrot.slane %v479_v54, %v4315_v5 }
  0x4c   :  { %2718 = vmatprep.mubr.f32.mxu0 %v443_v56  ;;  %2724 = vmatprep.subr.mxu0 %v122_v59  ;;  %v134_v56 = vld [vmem:[#allocation5 + $0x238] sm:$0x3f]  ;;  %v85_v59 = vld [vmem:[#allocation5 + $0xb0] sm:$0x3f] }
  0x51   :  { %1039 = vmatmul.mubr.f32.vlgmr.msra.gmra.mrb[0].mxu1 %v231_v50  ;;  %2719 = vmatmul.mubr.f32.vlgmr.msra.gmra.mrb[0].mxu0 %v435_v51  ;;  %v290_v50 = vcombine.high %v282_v47, %v282_v47  ;;  %v275_v51 = vcombine.high %v44_v43, %v44_v43  ;;  %v144_v43 = vld [vmem:[#allocation5 + $0x288] sm:$0x3f] }
  0x52   :  { %1045 = vmatpush1.xpose.msra.mxu1 %v73_v62  ;;  %2725 = vmatpush1.xpose.msra.mxu0 %v121_v0  ;;  %v495_v62 = vcombine.high %v493_v58, %v493_v58  ;;  %v88_v0 = vld [vmem:[#allocation5 + $0xc8] sm:$0x3f] }
  0x53   :  { %1108 = vmatprep.mubr.f32.mxu1 %v240_v63  ;;  %1114 = vmatprep.subr.mxu1 %v76_v3  ;;  %v289_v57 = vrot.slane %v275_v51, %v4315_v5  ;;  %v45_v63 = vld [vmem:[#allocation2 + $0x30] sm:$0xff] }
  0x54   :  { %2788 = vmatprep.mubr.f32.mxu0 %v444_v1  ;;  %2794 = vmatprep.subr.mxu0 %v124_v6  ;;  %v57_v1 = vld [vmem:[#allocation2 + $0x90] sm:$0xff]  ;;  %v299_v3 = vrot.slane %v45_v63, %v4315_v5  ;;  %v87_v6 = vld [vmem:[#allocation5 + $0xc0] sm:$0x3f] }
  0x55   :  { %v503_v4 = vrot.slane %v57_v1, %v4315_v5  ;;  %v496_v11 = vcombine.high %v57_v1, %v57_v1 }
  0x59   :  { %1109 = vmatmul.mubr.f32.vlgmr.msra.gmra.mrb[0].mxu1 %v238_v60  ;;  %2789 = vmatmul.mubr.f32.vlgmr.msra.gmra.mrb[0].mxu0 %v442_v61  ;;  %v291_v60 = vcombine.high %v289_v57, %v289_v57  ;;  %v133_v61 = vld [vmem:[#allocation5 + $0x230] sm:$0x3f] }
  0x5a   :  { %1115 = vmatpush1.xpose.msra.mxu1 %v75_v9  ;;  %2795 = vmatpush1.xpose.msra.mxu0 %v123_v12  ;;  %v135_v9 = vld [vmem:[#allocation5 + $0x240] sm:$0x3f]  ;;  %v90_v12 = vld [vmem:[#allocation5 + $0xd8] sm:$0x3f] }
  0x5b   :  { %1178 = vmatprep.mubr.f32.mxu1 %v256_v10  ;;  %1184 = vmatprep.subr.mxu1 %v78_v15  ;;  %v511_v10 = vcombine.high %v503_v4, %v503_v4  ;;  %v510_v15 = vrot.slane %v496_v11, %v4315_v5 }
  0x5c   :  { %2858 = vmatprep.mubr.f32.mxu0 %v460_v13  ;;  %2864 = vmatprep.subr.mxu0 %v126_v16  ;;  %v138_v13 = vld [vmem:[#allocation5 + $0x258] sm:$0x3f]  ;;  %v89_v16 = vld [vmem:[#allocation5 + $0xd0] sm:$0x3f] }
  0x61   :  { %1179 = vmatmul.mubr.f32.vlgmr.msra.gmra.mrb[0].mxu1 %v248_v7  ;;  %2859 = vmatmul.mubr.f32.vlgmr.msra.gmra.mrb[0].mxu0 %v452_v8  ;;  %v307_v7 = vcombine.high %v299_v3, %v299_v3  ;;  %v292_v8 = vcombine.high %v45_v63, %v45_v63  ;;  %v148_v63 = vld [vmem:[#allocation5 + $0x2a8] sm:$0x3f] }
  0x62   :  { %1185 = vmatpush1.xpose.msra.mxu1 %v77_v19  ;;  %2865 = vmatpush1.xpose.msra.mxu0 %v125_v21  ;;  %v512_v19 = vcombine.high %v510_v15, %v510_v15  ;;  %v92_v21 = vld [vmem:[#allocation5 + $0xe8] sm:$0x3f] }
  0x63   :  { %1248 = vmatprep.mubr.f32.mxu1 %v257_v20  ;;  %1254 = vmatprep.subr.mxu1 %v80_v24  ;;  %v306_v14 = vrot.slane %v292_v8, %v4315_v5  ;;  %v46_v20 = vld [vmem:[#allocation2 + $0x38] sm:$0xff] }
  0x64   :  { %2928 = vmatprep.mubr.f32.mxu0 %v461_v22  ;;  %2934 = vmatprep.subr.mxu0 %v128_v26  ;;  %v58_v22 = vld [vmem:[#allocation2 + $0x98] sm:$0xff]  ;;  %v316_v24 = vrot.slane %v46_v20, %v4315_v5  ;;  %v91_v26 = vld [vmem:[#allocation5 + $0xe0] sm:$0x3f] }
  0x65   :  { %v520_v25 = vrot.slane %v58_v22, %v4315_v5  ;;  %v513_v31 = vcombine.high %v58_v22, %v58_v22 }
  0x69   :  { %1249 = vmatmul.mubr.f32.vlgmr.msra.gmra.mrb[0].mxu1 %v255_v17  ;;  %2929 = vmatmul.mubr.f32.vlgmr.msra.gmra.mrb[0].mxu0 %v459_v18  ;;  %v308_v17 = vcombine.high %v306_v14, %v306_v14  ;;  %v137_v18 = vld [vmem:[#allocation5 + $0x250] sm:$0x3f] }
  0x6a   :  { %1255 = vmatpush1.xpose.msra.mxu1 %v79_v29  ;;  %2935 = vmatpush1.xpose.msra.mxu0 %v127_v32  ;;  %v139_v29 = vld [vmem:[#allocation5 + $0x260] sm:$0x3f]  ;;  %v94_v32 = vld [vmem:[#allocation5 + $0xf8] sm:$0x3f] }
  0x6b   :  { %1318 = vmatprep.mubr.f32.mxu1 %v273_v30  ;;  %1324 = vmatprep.subr.mxu1 %v82_v35  ;;  %v528_v30 = vcombine.high %v520_v25, %v520_v25  ;;  %v527_v35 = vrot.slane %v513_v31, %v4315_v5 }
  0x6c   :  { %2998 = vmatprep.mubr.f32.mxu0 %v477_v33  ;;  %3004 = vmatprep.subr.mxu0 %v130_v36  ;;  %v142_v33 = vld [vmem:[#allocation5 + $0x278] sm:$0x3f]  ;;  %v93_v36 = vld [vmem:[#allocation5 + $0xf0] sm:$0x3f] }
  0x71   :  { %1319 = vmatmul.mubr.f32.vlgmr.msra.gmra.mrb[0].mxu1 %v265_v27  ;;  %2999 = vmatmul.mubr.f32.vlgmr.msra.gmra.mrb[0].mxu0 %v469_v28  ;;  %v324_v27 = vcombine.high %v316_v24, %v316_v24  ;;  %v309_v28 = vcombine.high %v46_v20, %v46_v20  ;;  %v152_v20 = vld [vmem:[#allocation5 + $0x2c8] sm:$0x3f] }
  0x72   :  { %1325 = vmatpush1.xpose.msra.mxu1 %v81_v39  ;;  %3005 = vmatpush1.xpose.msra.mxu0 %v129_v41  ;;  %v529_v39 = vcombine.high %v527_v35, %v527_v35  ;;  %v96_v41 = vld [vmem:[#allocation5 + $0x108] sm:$0x3f] }
  0x73   :  { %1388 = vmatprep.mubr.f32.mxu1 %v274_v40  ;;  %1394 = vmatprep.subr.mxu1 %v84_v44  ;;  %v323_v34 = vrot.slane %v309_v28, %v4315_v5  ;;  %v47_v40 = vld [vmem:[#allocation2 + $0x40] sm:$0xff] }
  0x74   :  { %3068 = vmatprep.mubr.f32.mxu0 %v478_v42  ;;  %3074 = vmatprep.subr.mxu0 %v132_v46  ;;  %v59_v42 = vld [vmem:[#allocation2 + $0xa0] sm:$0xff]  ;;  %v333_v44 = vrot.slane %v47_v40, %v4315_v5 }
  0x75   :  { %v537_v45 = vrot.slane %v59_v42, %v4315_v5  ;;  %v95_v46 = vld [vmem:[#allocation5 + $0x100] sm:$0x3f]  ;;  %v530_v51 = vcombine.high %v59_v42, %v59_v42 }
  0x79   :  { %1389 = vmatmul.mubr.f32.vlgmr.msra.gmra.mrb[0].mxu1 %v272_v37  ;;  %3069 = vmatmul.mubr.f32.vlgmr.msra.gmra.mrb[0].mxu0 %v476_v38  ;;  %v325_v37 = vcombine.high %v323_v34, %v323_v34  ;;  %v141_v38 = vld [vmem:[#allocation5 + $0x270] sm:$0x3f] }
  0x7a   :  { %1395 = vmatpush1.xpose.msra.mxu1 %v83_v49  ;;  %3075 = vmatpush1.xpose.msra.mxu0 %v131_v52  ;;  %v143_v49 = vld [vmem:[#allocation5 + $0x280] sm:$0x3f]  ;;  %v98_v52 = vld [vmem:[#allocation5 + $0x118] sm:$0x3f] }
  0x7b   :  { %1458 = vmatprep.mubr.f32.mxu1 %v290_v50  ;;  %1464 = vmatprep.subr.mxu1 %v86_v55  ;;  %v545_v50 = vcombine.high %v537_v45, %v537_v45  ;;  %v544_v55 = vrot.slane %v530_v51, %v4315_v5 }
  0x7c   :  { %3138 = vmatprep.mubr.f32.mxu0 %v494_v53  ;;  %3144 = vmatprep.subr.mxu0 %v134_v56  ;;  %v146_v53 = vld [vmem:[#allocation5 + $0x298] sm:$0x3f]  ;;  %v97_v56 = vld [vmem:[#allocation5 + $0x110] sm:$0x3f] }
  0x81   :  { %1459 = vmatmul.mubr.f32.vlgmr.msra.gmra.mrb[0].mxu1 %v282_v47  ;;  %3139 = vmatmul.mubr.f32.vlgmr.msra.gmra.mrb[0].mxu0 %v486_v48  ;;  %v341_v47 = vcombine.high %v333_v44, %v333_v44  ;;  %v326_v48 = vcombine.high %v47_v40, %v47_v40  ;;  %v156_v40 = vld [vmem:[#allocation5 + $0x2e8] sm:$0x3f] }
  0x82   :  { %1465 = vmatpush1.xpose.msra.mxu1 %v85_v59  ;;  %3145 = vmatpush1.xpose.msra.mxu0 %v133_v61  ;;  %v546_v59 = vcombine.high %v544_v55, %v544_v55  ;;  %v100_v61 = vld [vmem:[#allocation5 + $0x128] sm:$0x3f] }
  0x83   :  { %1528 = vmatprep.mubr.f32.mxu1 %v291_v60  ;;  %1534 = vmatprep.subr.mxu1 %v88_v0  ;;  %v340_v54 = vrot.slane %v326_v48, %v4315_v5  ;;  %v48_v60 = vld [vmem:[#allocation2 + $0x48] sm:$0xff] }
  0x84   :  { %3208 = vmatprep.mubr.f32.mxu0 %v495_v62  ;;  %3214 = vmatprep.subr.mxu0 %v136_v2  ;;  %v60_v62 = vld [vmem:[#allocation2 + $0xa8] sm:$0xff]  ;;  %v350_v0 = vrot.slane %v48_v60, %v4315_v5  ;;  %v99_v2 = vld [vmem:[#allocation5 + $0x120] sm:$0x3f] }
  0x85   :  { %v554_v1 = vrot.slane %v60_v62, %v4315_v5  ;;  %v547_v8 = vcombine.high %v60_v62, %v60_v62 }
  0x89   :  { %1529 = vmatmul.mubr.f32.vlgmr.msra.gmra.mrb[0].mxu1 %v289_v57  ;;  %3209 = vmatmul.mubr.f32.vlgmr.msra.gmra.mrb[0].mxu0 %v493_v58  ;;  %v342_v57 = vcombine.high %v340_v54, %v340_v54  ;;  %v145_v58 = vld [vmem:[#allocation5 + $0x290] sm:$0x3f] }
  0x8a   :  { %1535 = vmatpush1.xpose.msra.mxu1 %v87_v6  ;;  %3215 = vmatpush1.xpose.msra.mxu0 %v135_v9  ;;  %v147_v6 = vld [vmem:[#allocation5 + $0x2a0] sm:$0x3f]  ;;  %v102_v9 = vld [vmem:[#allocation5 + $0x138] sm:$0x3f] }
  0x8b   :  { %1598 = vmatprep.mubr.f32.mxu1 %v307_v7  ;;  %1604 = vmatprep.subr.mxu1 %v90_v12  ;;  %v562_v7 = vcombine.high %v554_v1, %v554_v1  ;;  %v561_v12 = vrot.slane %v547_v8, %v4315_v5 }
  0x8c   :  { %3278 = vmatprep.mubr.f32.mxu0 %v511_v10  ;;  %3284 = vmatprep.subr.mxu0 %v138_v13  ;;  %v150_v10 = vld [vmem:[#allocation5 + $0x2b8] sm:$0x3f]  ;;  %v101_v13 = vld [vmem:[#allocation5 + $0x130] sm:$0x3f] }
  0x91   :  { %1599 = vmatmul.mubr.f32.vlgmr.msra.gmra.mrb[0].mxu1 %v299_v3  ;;  %3279 = vmatmul.mubr.f32.vlgmr.msra.gmra.mrb[0].mxu0 %v503_v4  ;;  %v358_v3 = vcombine.high %v350_v0, %v350_v0  ;;  %v343_v4 = vcombine.high %v48_v60, %v48_v60 }
  0x92   :  { %1605 = vmatpush1.xpose.msra.mxu1 %v89_v16  ;;  %3285 = vmatpush1.xpose.msra.mxu0 %v137_v18  ;;  %v563_v16 = vcombine.high %v561_v12, %v561_v12  ;;  %v104_v18 = vld [vmem:[#allocation5 + $0x148] sm:$0x3f] }
  0x93   :  { %1668 = vmatprep.mubr.f32.mxu1 %v308_v17  ;;  %1674 = vmatprep.subr.mxu1 %v92_v21  ;;  %v357_v11 = vrot.slane %v343_v4, %v4315_v5  ;;  %v49_v17 = vld [vmem:[#allocation2 + $0x50] sm:$0xff] }
  0x94   :  { %3348 = vmatprep.mubr.f32.mxu0 %v512_v19  ;;  %3354 = vmatprep.subr.mxu0 %v140_v23  ;;  %v61_v19 = vld [vmem:[#allocation2 + $0xb0] sm:$0xff]  ;;  %v367_v21 = vrot.slane %v49_v17, %v4315_v5  ;;  %v103_v23 = vld [vmem:[#allocation5 + $0x140] sm:$0x3f] }
  0x95   :  { %v571_v22 = vrot.slane %v61_v19, %v4315_v5  ;;  %v564_v28 = vcombine.high %v61_v19, %v61_v19 }
  0x99   :  { %1669 = vmatmul.mubr.f32.vlgmr.msra.gmra.mrb[0].mxu1 %v306_v14  ;;  %3349 = vmatmul.mubr.f32.vlgmr.msra.gmra.mrb[0].mxu0 %v510_v15  ;;  %v359_v14 = vcombine.high %v357_v11, %v357_v11  ;;  %v149_v15 = vld [vmem:[#allocation5 + $0x2b0] sm:$0x3f] }
  0x9a   :  { %1675 = vmatpush1.xpose.msra.mxu1 %v91_v26  ;;  %3355 = vmatpush1.xpose.msra.mxu0 %v139_v29  ;;  %v151_v26 = vld [vmem:[#allocation5 + $0x2c0] sm:$0x3f]  ;;  %v106_v29 = vld [vmem:[#allocation5 + $0x158] sm:$0x3f] }
  0x9b   :  { %1738 = vmatprep.mubr.f32.mxu1 %v324_v27  ;;  %1744 = vmatprep.subr.mxu1 %v94_v32  ;;  %v579_v27 = vcombine.high %v571_v22, %v571_v22  ;;  %v578_v32 = vrot.slane %v564_v28, %v4315_v5 }
  0x9c   :  { %3418 = vmatprep.mubr.f32.mxu0 %v528_v30  ;;  %3424 = vmatprep.subr.mxu0 %v142_v33  ;;  %v154_v30 = vld [vmem:[#allocation5 + $0x2d8] sm:$0x3f]  ;;  %v105_v33 = vld [vmem:[#allocation5 + $0x150] sm:$0x3f] }
  0xa1   :  { %1739 = vmatmul.mubr.f32.vlgmr.msra.gmra.mrb[0].mxu1 %v316_v24  ;;  %3419 = vmatmul.mubr.f32.vlgmr.msra.gmra.mrb[0].mxu0 %v520_v25  ;;  %v375_v24 = vcombine.high %v367_v21, %v367_v21  ;;  %v360_v25 = vcombine.high %v49_v17, %v49_v17 }
  0xa2   :  { %1745 = vmatpush1.xpose.msra.mxu1 %v93_v36  ;;  %3425 = vmatpush1.xpose.msra.mxu0 %v141_v38  ;;  %v580_v36 = vcombine.high %v578_v32, %v578_v32  ;;  %v108_v38 = vld [vmem:[#allocation5 + $0x168] sm:$0x3f] }
  0xa3   :  { %1808 = vmatprep.mubr.f32.mxu1 %v325_v37  ;;  %1814 = vmatprep.subr.mxu1 %v96_v41  ;;  %v374_v31 = vrot.slane %v360_v25, %v4315_v5  ;;  %v50_v37 = vld [vmem:[#allocation2 + $0x58] sm:$0xff] }
  0xa4   :  { %3488 = vmatprep.mubr.f32.mxu0 %v529_v39  ;;  %3494 = vmatprep.subr.mxu0 %v144_v43  ;;  %v62_v39 = vld [vmem:[#allocation2 + $0xb8] sm:$0xff]  ;;  %v384_v41 = vrot.slane %v50_v37, %v4315_v5  ;;  %v107_v43 = vld [vmem:[#allocation5 + $0x160] sm:$0x3f] }
  0xa5   :  { %v588_v42 = vrot.slane %v62_v39, %v4315_v5  ;;  %v581_v48 = vcombine.high %v62_v39, %v62_v39 }
  0xa9   :  { %1809 = vmatmul.mubr.f32.vlgmr.msra.gmra.mrb[0].mxu1 %v323_v34  ;;  %3489 = vmatmul.mubr.f32.vlgmr.msra.gmra.mrb[0].mxu0 %v527_v35  ;;  %v376_v34 = vcombine.high %v374_v31, %v374_v31  ;;  %v153_v35 = vld [vmem:[#allocation5 + $0x2d0] sm:$0x3f] }
  0xaa   :  { %1815 = vmatpush1.xpose.msra.mxu1 %v95_v46  ;;  %3495 = vmatpush1.xpose.msra.mxu0 %v143_v49  ;;  %v155_v46 = vld [vmem:[#allocation5 + $0x2e0] sm:$0x3f]  ;;  %v110_v49 = vld [vmem:[#allocation5 + $0x178] sm:$0x3f] }
  0xab   :  { %1878 = vmatprep.mubr.f32.mxu1 %v341_v47  ;;  %1884 = vmatprep.subr.mxu1 %v98_v52  ;;  %v596_v47 = vcombine.high %v588_v42, %v588_v42  ;;  %v595_v52 = vrot.slane %v581_v48, %v4315_v5 }
  0xac   :  { %3558 = vmatprep.mubr.f32.mxu0 %v545_v50  ;;  %3564 = vmatprep.subr.mxu0 %v146_v53  ;;  %v158_v50 = vld [vmem:[#allocation5 + $0x2f8] sm:$0x3f]  ;;  %v109_v53 = vld [vmem:[#allocation5 + $0x170] sm:$0x3f] }
  0xb1   :  { %1879 = vmatmul.mubr.f32.vlgmr.msra.gmra.mrb[0].mxu1 %v333_v44  ;;  %3559 = vmatmul.mubr.f32.vlgmr.msra.gmra.mrb[0].mxu0 %v537_v45  ;;  %v392_v44 = vcombine.high %v384_v41, %v384_v41  ;;  %v377_v45 = vcombine.high %v50_v37, %v50_v37 }
  0xb2   :  { %1885 = vmatpush1.xpose.msra.mxu1 %v97_v56  ;;  %3565 = vmatpush1.xpose.msra.mxu0 %v145_v58  ;;  %v597_v56 = vcombine.high %v595_v52, %v595_v52 }
  0xb3   :  { %1948 = vmatprep.mubr.f32.mxu1 %v342_v57  ;;  %1954 = vmatprep.subr.mxu1 %v100_v61  ;;  %v391_v51 = vrot.slane %v377_v45, %v4315_v5  ;;  %v4072_v57 = vld [vmem:[%s4382_s2] ss:$0 sm:$0xff] }
  0xb4   :  { %3628 = vmatprep.mubr.f32.mxu0 %v546_v59  ;;  %3634 = vmatprep.subr.mxu0 %v148_v63 }
  0xb9   :  { %1949 = vmatmul.mubr.f32.vlgmr.msra.gmra.mrb[0].mxu1 %v340_v54  ;;  %3629 = vmatmul.mubr.f32.vlgmr.msra.gmra.mrb[0].mxu0 %v544_v55  ;;  %v393_v54 = vcombine.high %v391_v51, %v391_v51  ;;  %v157_v55 = vld [vmem:[#allocation5 + $0x2f0] sm:$0x3f] }
  0xba   :  { %1955 = vmatpush1.xpose.msra.mxu1 %v99_v2  ;;  %3635 = vmatpush1.xpose.msra.mxu0 %v147_v6 }
  0xbb   :  { %2018 = vmatprep.mubr.f32.mxu1 %v358_v3  ;;  %2024 = vmatprep.subr.mxu1 %v102_v9 }
  0xbc   :  { %3698 = vmatprep.mubr.f32.mxu0 %v562_v7  ;;  %3704 = vmatprep.subr.mxu0 %v150_v10 }
  0xc1   :  { %2019 = vmatmul.mubr.f32.vlgmr.msra.gmra.mrb[0].mxu1 %v350_v0  ;;  %3699 = vmatmul.mubr.f32.vlgmr.msra.gmra.mrb[0].mxu0 %v554_v1 }
  0xc2   :  { %2025 = vmatpush1.xpose.msra.mxu1 %v101_v13  ;;  %3705 = vmatpush1.xpose.msra.mxu0 %v149_v15 }
  0xc3   :  { %2088 = vmatprep.mubr.f32.mxu1 %v359_v14  ;;  %2094 = vmatprep.subr.mxu1 %v104_v18 }
  0xc4   :  { %3768 = vmatprep.mubr.f32.mxu0 %v563_v16  ;;  %3774 = vmatprep.subr.mxu0 %v152_v20 }
  0xc9   :  { %2089 = vmatmul.mubr.f32.vlgmr.msra.gmra.mrb[0].mxu1 %v357_v11  ;;  %3769 = vmatmul.mubr.f32.vlgmr.msra.gmra.mrb[0].mxu0 %v561_v12 }
  0xca   :  { %2095 = vmatpush1.xpose.msra.mxu1 %v103_v23  ;;  %3775 = vmatpush1.xpose.msra.mxu0 %v151_v26 }
  0xcb   :  { %2158 = vmatprep.mubr.f32.mxu1 %v375_v24  ;;  %2164 = vmatprep.subr.mxu1 %v106_v29 }
  0xcc   :  { %3838 = vmatprep.mubr.f32.mxu0 %v579_v27  ;;  %3844 = vmatprep.subr.mxu0 %v154_v30 }
  0xd1   :  { %2159 = vmatmul.mubr.f32.vlgmr.msra.gmra.mrb[0].mxu1 %v367_v21  ;;  %3839 = vmatmul.mubr.f32.vlgmr.msra.gmra.mrb[0].mxu0 %v571_v22 }
  0xd2   :  { %2165 = vmatpush1.xpose.msra.mxu1 %v105_v33  ;;  %3845 = vmatpush1.xpose.msra.mxu0 %v153_v35 }
  0xd3   :  { %2228 = vmatprep.mubr.f32.mxu1 %v376_v34  ;;  %2234 = vmatprep.subr.mxu1 %v108_v38 }
  0xd4   :  { %3908 = vmatprep.mubr.f32.mxu0 %v580_v36  ;;  %3914 = vmatprep.subr.mxu0 %v156_v40 }
  0xd9   :  { %2229 = vmatmul.mubr.f32.vlgmr.msra.gmra.mrb[0].mxu1 %v374_v31  ;;  %3909 = vmatmul.mubr.f32.vlgmr.msra.gmra.mrb[0].mxu0 %v578_v32 }
  0xda   :  { %2235 = vmatpush1.xpose.msra.mxu1 %v107_v43  ;;  %3915 = vmatpush1.xpose.msra.mxu0 %v155_v46 }
  0xdb   :  { %2298 = vmatprep.mubr.f32.mxu1 %v392_v44  ;;  %2304 = vmatprep.subr.mxu1 %v110_v49 }
  0xdc   :  { %3978 = vmatprep.mubr.f32.mxu0 %v596_v47  ;;  %3984 = vmatprep.subr.mxu0 %v158_v50 }
  0xe1   :  { %2299 = vmatmul.mubr.f32.vlgmr.msra.gmra.mrb[0].mxu1 %v384_v41  ;;  %3979 = vmatmul.mubr.f32.vlgmr.msra.gmra.mrb[0].mxu0 %v588_v42 }
  0xe2   :  { %2305 = vmatpush1.xpose.msra.mxu1 %v109_v53  ;;  %3985 = vmatpush1.xpose.msra.mxu0 %v157_v55 }
  0xe3   :  { %2368 = vmatprep.mubr.f32.mxu1 %v393_v54  ;;  %4048 = vmatprep.mubr.f32.mxu0 %v597_v56 }
  0xe9   :  { %2369 = vmatmul.mubr.f32.vlgmr.msra.gmra.mrb[0].mxu1 %v391_v51  ;;  %4049 = vmatmul.mubr.f32.vlgmr.msra.gmra.mrb[0].mxu0 %v595_v52 }
 0x1bc   :  { %v2370_v58 = vpop.f32.mrb[0].mxu1  ;;  %v4050_v59 = vpop.f32.mrb[0].mxu0 }
 0x1bd   :  { %v4073_v5 = vadd.f32 %v4072_v57, %v2370_v58  ;;  %v2372_v60 = vpop.f32.mrb[1].mxu1  ;;  %v4052_v61 = vpop.f32.mrb[1].mxu0 }
 0x1bf   :  { %v4074_v62 = vadd.f32 %v4073_v5, %v4050_v59 }
 0x1c1   :  { %4055 = vst.msk [vmem:[#allocation7] sm:$0x3] %vm4054_vm0, %v4074_v62 }
 0x1c2   :  { %4250 = shalt.err (!%p4247_p6)
}
 0x1c3   :  { %s4251_s13 = scalar_lea.hbm %s4383_s3, 32 }
 0x1c4   :  { %p4252_p7 = scmp.ne.s32.totalorder %s4383_s3, %s4251_s13  ;;  %p4255_p8 = scmp.lt.u32.totalorder %s4251_s13, %s4383_s3 }
 0x1c6   :  { %p4257_p9 = pnand %p4255_p8, %p4252_p7 }
 0x1c8   :  { %4260 = shalt.err (!%p4257_p9)
}
 0x1c9   :  { %4065 = dma.vmem_to_hbm [thread:$0]  %s4063_s10, 32, %s4383_s3, [#allocation4]  }
 0x1ca   :  { %4265 = dma.done.wait [#allocation4], 32  }
 0x1cb   :  { %4266 = vsyncadd [#allocation4], 4294967264 }
 0x1cc   :  { %4069 = vsyncpa [#allocation3], 1 }
 0x1cd   :  { %4070 = vsyncpa [#allocation6], 1 }
 0x1ce   :  { %4071 = vsyncpa [#allocation4], 1 }

</bundles_post_ra>
